<compile_context>
chip_gen: v5e
topology: v5e:2x2
jax: 0.10.0
libtpu: 0.0.40
codegen_flags: <defaults>
</compile_context>

<pallas_src>
import math

import jax
import jax.numpy as jnp
from jax.experimental import pallas as pl
from jax.experimental.pallas import tpu as pltpu

LANES = 128
_TARGET_BLOCK_BYTES = 4 * 1024 * 1024    # ~4 MiB x-block: past roofline knee,
                                         # 2x-in + 2x-out buffers ~= 16 MiB
_MAX_COL_TILE = 8192                     # tile channel axis past this lane width
_VMEM_LIMIT_BYTES = 32 * 1024 * 1024     # explicit: > v5e's 16 MiB scoped default,
                                         # well under v7x's 64 MiB physical


def dyt_kernel(params_ref, x_ref, o_ref):
    # params_ref: (3, tc) float32 = [alpha; gamma; beta].  x/o: (tile, tc) I/O dtype.
    p = params_ref[...]
    a = p[0:1, :]
    g = p[1:2, :]
    b = p[2:3, :]
    x = x_ref[...].astype(jnp.float32)       # compute in f32
    y = g * jnp.tanh(a * x) + b              # tanh -> EUP; muls/add -> VPU (co-issue)
    o_ref[...] = y.astype(o_ref.dtype)       # downcast (if any) on the store path


def _row_align(itemsize):
    # Sub-32-bit dtypes pack along sublanes: keep row tiles packing-friendly.
    return {4: 8, 2: 16, 1: 32}.get(itemsize, 8)


def _pick_col_tile(cw):
    # cw is always a multiple of 128 (lane-dense).  Keep wide blocks and let
    # Pallas clip the last partial column block (cdiv grid) instead of falling
    # back to tiny exact divisors.
    return min(cw, _MAX_COL_TILE)


def _pick_row_tile(n_rows, tc, itemsize, align):
    rows = _TARGET_BLOCK_BYTES // max(1, tc * itemsize)
    rows = max(align, (rows // align) * align)
    if n_rows > rows:
        return rows                      # >= 2 row blocks automatically
    # Whole array fits in one block: split into >= 2 row blocks when possible
    # so both v7x TensorCores get work (one extra ~0.35us step elsewhere).
    if n_rows >= 2 * align:
        half = pl.cdiv(n_rows, 2)
        return ((half + align - 1) // align) * align
    return n_rows                        # too small to split; tile == full dim


def dyt(x, alpha, gamma, beta):
    """x: (..., C) float array. alpha/gamma/beta: (C,) float32 parameters."""
    orig_shape = x.shape
    C = orig_shape[-1]
    x2 = x.reshape(-1, C)
    N = x2.shape[0]
    itemsize = jnp.dtype(x.dtype).itemsize

    # Fold k consecutive rows into the lane axis so the last dim is a multiple
    # of 128 (lane-dense output).  Per-channel params repeat exactly k times.
    k = 1 if C % LANES == 0 else LANES // math.gcd(C, LANES)
    Cw = k * C

    Nw = pl.cdiv(N, k)                   # packed-row count
    Np = Nw * k                          # flat rows after (at most k-1 rows of) padding
    if Np > N:                           # only when k > 1 and N % k != 0: tiny pad
        x2 = jnp.pad(x2, ((0, Np - N), (0, 0)))
    xw = x2.reshape(Nw, Cw)

    tc = _pick_col_tile(Cw)
    tile = _pick_row_tile(Nw, tc, itemsize, _row_align(itemsize))

    # Column axis OUTER so the param block is constant across the inner row
    # loop; cdiv grids + Pallas boundary clipping (no full-array padding).
    grid = (pl.cdiv(Cw, tc), pl.cdiv(Nw, tile))

    # Keep learned parameters in float32; pack into one (3, Cw) array.
    params = jnp.stack(
        [
            jnp.tile(alpha.astype(jnp.float32).reshape(-1), k),
            jnp.tile(gamma.astype(jnp.float32).reshape(-1), k),
            jnp.tile(beta.astype(jnp.float32).reshape(-1), k),
        ],
        axis=0,
    )  # (3, Cw)

    out = pl.pallas_call(
        dyt_kernel,
        out_shape=jax.ShapeDtypeStruct((Nw, Cw), x.dtype),
        grid_spec=pltpu.PrefetchScalarGridSpec(
            num_scalar_prefetch=0,
            grid=grid,
            in_specs=[
                pl.BlockSpec((3, tc), lambda j, i: (0, j)),       # packed params
                pl.BlockSpec((tile, tc), lambda j, i: (i, j)),    # x
            ],
            out_specs=pl.BlockSpec((tile, tc), lambda j, i: (i, j)),
        ),
        compiler_params=pltpu.CompilerParams(
            dimension_semantics=("parallel", "parallel"),
            vmem_limit_bytes=_VMEM_LIMIT_BYTES,
        ),
    )(params, xw)

    if k > 1:
        out = out.reshape(Np, C)
        if Np > N:
            out = out[:N]
    return out.reshape(orig_shape)


if __name__ == "__main__":
    key = jax.random.PRNGKey(0)
    B, T, C = 2, 8, 32
    init_alpha = 0.2

    # Deterministic parameter init, matching DyT.__init__
    alpha = jnp.ones((C,), jnp.float32) * init_alpha
    gamma = jnp.ones((C,), jnp.float32)
    beta = jnp.zeros((C,), jnp.float32)

    x = jax.random.normal(key, (B, T, C), jnp.float32)

    y = dyt(x, alpha, gamma, beta)
    jax.block_until_ready(y)

    # Reference check (plain JAX)
    y_ref = gamma * jnp.tanh(alpha * x) + beta
    assert jnp.allclose(y, y_ref, atol=1e-5, rtol=1e-5), "f32 mismatch vs reference"

    # Check 2: bf16 I/O, C not a multiple of 128, N not a multiple of k
    # (exercises the lane-fold + minimal-pad path; params stay f32, compute in
    # f32, cast on store).
    xb32 = jax.random.normal(jax.random.PRNGKey(0), (2, 7, 48), jnp.float32)
    alpha_b = jnp.full((48,), 0.2, jnp.float32)
    gamma_b = jnp.linspace(0.5, 1.5, 48, dtype=jnp.float32)
    beta_b = jnp.linspace(-0.1, 0.1, 48, dtype=jnp.float32)
    xb = xb32.astype(jnp.bfloat16)
    yb = dyt(xb, alpha_b, gamma_b, beta_b)
    jax.block_until_ready(yb)
    yb_ref = gamma_b * jnp.tanh(alpha_b * xb.astype(jnp.float32)) + beta_b
    assert jnp.allclose(yb.astype(jnp.float32), yb_ref, atol=2e-2, rtol=2e-2), \
        "bf16 mismatch vs reference"

    # Check 3: C multiple of 128 with a ragged row count -> no padding, no
    # output slice; last row block is clipped by Pallas (masked writes).
    xc = jax.random.normal(jax.random.PRNGKey(1), (5, 8, 128), jnp.float32)
    alpha_c = jnp.full((128,), 0.2, jnp.float32)
    gamma_c = jnp.linspace(0.5, 1.5, 128, dtype=jnp.float32)
    beta_c = jnp.linspace(-0.1, 0.1, 128, dtype=jnp.float32)
    yc = dyt(xc, alpha_c, gamma_c, beta_c)
    jax.block_until_ready(yc)
    yc_ref = gamma_c * jnp.tanh(alpha_c * xc) + beta_c
    assert jnp.allclose(yc, yc_ref, atol=1e-5, rtol=1e-5), \
        "clipped-row-block mismatch vs reference"

    print("KERNEL_OK")
</pallas_src>

<mosaic_0001>
module attributes {stable_mosaic.version = 11 : i64} {
  func.func @dyt_kernel(%arg0: i32, %arg1: i32, %arg2: memref<3x128xf32, #tpu.memory_space<vmem>>, %arg3: memref<4x128xf32, #tpu.memory_space<vmem>>, %arg4: memref<4x128xf32, #tpu.memory_space<vmem>>) attributes {dimension_semantics = [#tpu.dimension_semantics<parallel>, #tpu.dimension_semantics<parallel>], iteration_bounds = array<i64: 1, 1>, scalar_prefetch = 0 : i64, scratch_operands = 0 : i64, tpu.core_type = #tpu.core_type<tc>, window_params = [{transform_indices = @transform_0, window_bounds = array<i64: 3, 128>}, {transform_indices = @transform_1, window_bounds = array<i64: 4, 128>}, {transform_indices = @transform_2, window_bounds = array<i64: 4, 128>}]} {
    %c0 = arith.constant 0 : index
    %c0_0 = arith.constant 0 : index
    %0 = vector.load %arg2[%c0, %c0_0] : memref<3x128xf32, #tpu.memory_space<vmem>>, vector<3x128xf32>
    %1 = vector.extract_strided_slice %0 {offsets = [0, 0], sizes = [1, 128], strides = [1, 1]} : vector<3x128xf32> to vector<1x128xf32>
    %2 = vector.extract_strided_slice %0 {offsets = [1, 0], sizes = [1, 128], strides = [1, 1]} : vector<3x128xf32> to vector<1x128xf32>
    %3 = vector.extract_strided_slice %0 {offsets = [2, 0], sizes = [1, 128], strides = [1, 1]} : vector<3x128xf32> to vector<1x128xf32>
    %c0_1 = arith.constant 0 : index
    %c0_2 = arith.constant 0 : index
    %4 = vector.load %arg3[%c0_1, %c0_2] : memref<4x128xf32, #tpu.memory_space<vmem>>, vector<4x128xf32>
    %5 = vector.broadcast %1 : vector<1x128xf32> to vector<4x128xf32>
    %6 = arith.mulf %5, %4 : vector<4x128xf32>
    %7 = math.tanh %6 : vector<4x128xf32>
    %8 = vector.broadcast %2 : vector<1x128xf32> to vector<4x128xf32>
    %9 = arith.mulf %8, %7 : vector<4x128xf32>
    %10 = vector.broadcast %3 : vector<1x128xf32> to vector<4x128xf32>
    %11 = arith.addf %9, %10 : vector<4x128xf32>
    %c0_3 = arith.constant 0 : index
    %c0_4 = arith.constant 0 : index
    %12 = vector.load %arg4[%c0_3, %c0_4] : memref<4x128xf32, #tpu.memory_space<vmem>>, vector<4x128xf32>
    tpu.vector_store %arg4[%c0_3, %c0_4], %11 {strides = array<i32>} : memref<4x128xf32, #tpu.memory_space<vmem>>, vector<4x128xf32>,
    return
  }
  func.func @transform_0(%arg0: i32, %arg1: i32) -> (i32, i32) {
    %c0_i32 = arith.constant 0 : i32
    %c0_i32_0 = arith.constant 0 : i32
    return %c0_i32, %arg0 : i32, i32
  }
  func.func @transform_1(%arg0: i32, %arg1: i32) -> (i32, i32) {
    %c0_i32 = arith.constant 0 : i32
    return %arg1, %arg0 : i32, i32
  }
  func.func @transform_2(%arg0: i32, %arg1: i32) -> (i32, i32) {
    %c0_i32 = arith.constant 0 : i32
    return %arg1, %arg0 : i32, i32
  }
}

</mosaic_0001>

<bundles_post_ra>
// kernel: tpu_custom_call.1
= control target key start
LH: loop header
LB: loop body
LE: loop exit
PB: predicated region body
PF: predicated region fallthrough
CT: control target
= control target key end

     0   :  { %7 = vsyncpa [#allocation3], 0  ;;  %s178_s0 = inlined_call_operand.hbm [shape: f32[3,128], index: 0, kind: input, shape index: {}]   ;;  %s179_s1 = inlined_call_operand.hbm [shape: f32[4,128], index: 1, kind: input, shape index: {}]   ;;  %s180_s2 = inlined_call_operand.hbm [shape: f32[4,128], index: 2, kind: output, shape index: {}]  }
   0x1   :  { %8 = vsyncpa [#allocation6], 0 }
   0x2   :  { %9 = vsyncpa [#allocation4], 0  ;;  %s15_s11 = sshll.u32 %s178_s0, 4  ;;  %s151_s12 = smov [#allocation2]   ;;  %s16_s11 = int_to_ptr.hbm [resolvable:$true] %s15_s11 }
   0x3   :  { %s17_s13 = sshll.u32 %s151_s12, 4  ;;  %s26_s16 = sshll.u32 %s179_s1, 4  ;;  %s18_s13 = int_to_ptr.vmem [resolvable:$true] %s17_s13  ;;  %s27_s16 = int_to_ptr.hbm [resolvable:$true] %s26_s16 }
   0x4   :  { %20 = dma.hbm_to_vmem [thread:$0]  %s16_s11, 64, %s18_s13, [#allocation3]  }
   0x5   :  { %s152_s17 = smov [#allocation5]  }
   0x6   :  { %s28_s18 = sshll.u32 %s152_s17, 4  ;;  %s29_s18 = int_to_ptr.vmem [resolvable:$true] %s28_s18 }
   0x7   :  { %31 = dma.hbm_to_vmem [thread:$0]  %s27_s16, 64, %s29_s18, [#allocation6]  }
   0x8   :  { %145 = dma.done.wait [#allocation3], 64  }
   0x9   :  { %146 = vsyncadd [#allocation3], 4294967232 }
   0xa   :  { %147 = dma.done.wait [#allocation6], 64  }
   0xb   :  { %148 = vsyncadd [#allocation6], 4294967232  ;;  %v40_v0 = vld [vmem:[#allocation2] sm:$0x7]  ;;  %v41_v1 = vld [vmem:[#allocation5] sm:$0xf] }
   0xc   :  { %v42_v2 = vperm.slane %v40_v0, 0  ;;  %v45_v4 = vperm.slane %v40_v0, 1  ;;  %v47_v5 = vperm.slane %v40_v0, 2  ;;  %s153_s0 = smov [#allocation7]   ;;  %s57_s21 = sshll.u32 %s180_s2, 4  ;;  %s58_s21 = int_to_ptr.hbm [resolvable:$true] %s57_s21 }
   0xd   :  { %s55_s1 = sshll.u32 %s153_s0, 4  ;;  %s56_s1 = int_to_ptr.vmem [resolvable:$true] %s55_s1 }
   0xe   :  { %v43_v3 = vmul.f32 %v42_v2, %v41_v1 }
  0x10   :  { %71 = vtanh.f32 %v43_v3 }
  0x16   :  { %v72_v6 = vpop.eup %71 }
  0x17   :  { %v46_v7 = vmul.f32 %v72_v6, %v45_v4 }
  0x19   :  { %v48_v8 = vadd.f32 %v47_v5, %v46_v7 }
  0x1b   :  { %49 = vst [vmem:[#allocation7] sm:$0xf] %v48_v8 }
  0x1c   :  { %60 = dma.vmem_to_hbm [thread:$0]  %s56_s1, 64, %s58_s21, [#allocation4]  }
  0x1d   :  { %149 = dma.done.wait [#allocation4], 64  }
  0x1e   :  { %150 = vsyncadd [#allocation4], 4294967232 }
  0x1f   :  { %65 = vsyncpa [#allocation3], 1 }
  0x20   :  { %66 = vsyncpa [#allocation6], 1 }
  0x21   :  { %67 = vsyncpa [#allocation4], 1 }

</bundles_post_ra>
